<compile_context>
chip_gen: v7x
topology: tpu7x:2x2x1
jax: 0.10.0
libtpu: 0.0.40
codegen_flags: <defaults>
</compile_context>

<pallas_src>
import functools

import jax
import jax.numpy as jnp
from jax import lax
from jax.experimental import pallas as pl
from jax.experimental.pallas import tpu as pltpu


def _round_up(x, m):
    return ((x + m - 1) // m) * m


def _temporal_block_kernel(*refs, K, d, P, Cout_p, has_downsample, fuse_c1, fuse_c2):
    """One (batch, time-tile) step of the fused TemporalBlock forward.

    refs (has_downsample): xhalo, xcur, w1s, b1, bd, w2, b2, out
    refs (identity res)  : xhalo, xcur, w1,  b1,     w2, b2, out

    xhalo: (Cin_p, HW)        last HW cols of the previous time tile (garbage @ tile 0)
    xcur : (Cin_p, TL)        current time tile (bf16)
    w1   : (Wm, K*Cin_p)      conv1 taps folded into contraction dim; rows [Cout_p:]
                              hold the 1x1 downsample weight in the last-tap block
    w2   : (Cout_p, K*Cout_p) conv2 taps folded into contraction dim
    b*   : (Cout_p, 1)        f32 biases
    out  : (Cout_p, TL)
    """
    if has_downsample:
        xhalo_ref, xcur_ref, w1_ref, b1_ref, bd_ref, w2_ref, b2_ref, out_ref = refs
    else:
        xhalo_ref, xcur_ref, w1_ref, b1_ref, w2_ref, b2_ref, out_ref = refs
        bd_ref = None

    ti = pl.program_id(1)
    Cin_p, TL = xcur_ref.shape
    _, HW = xhalo_ref.shape

    # ---- halo: last 2P columns of the previous tile; zero for the first tile -------
    prev_tail = xhalo_ref[:, HW - 2 * P:]                               # (Cin_p, 2P)
    prev_tail = jnp.where(ti > 0, prev_tail, jnp.zeros_like(prev_tail))
    xcur = xcur_ref[...]
    xh = jnp.concatenate([prev_tail, xcur], axis=1)                     # (Cin_p, TL+2P)

    # ---- conv1 (+ fused 1x1 downsample rows), output times [t0-P, t0+TL) -----------
    # column j of xh is global time t0 - 2P + j; tap k needs slice starting at k*d.
    w1 = w1_ref[...]
    if fuse_c1:
        x1 = jnp.concatenate([xh[:, k * d: k * d + TL + P] for k in range(K)], axis=0)
        y1 = jnp.dot(w1, x1, preferred_element_type=jnp.float32)        # (Wm, TL+P)
    else:
        y1 = jnp.dot(w1[:, :Cin_p], xh[:, :TL + P],
                     preferred_element_type=jnp.float32)
        for k in range(1, K):                                           # MRB-accumulable on v7x
            y1 = y1 + jnp.dot(w1[:, k * Cin_p:(k + 1) * Cin_p],
                              xh[:, k * d: k * d + TL + P],
                              preferred_element_type=jnp.float32)
    h1 = jnp.maximum(y1[:Cout_p] + b1_ref[...], 0.0)                    # (Cout_p, TL+P)
    # conv2's causal zero padding: h1 at global time < 0 must be zero (tile 0 only)
    col = lax.broadcasted_iota(jnp.int32, (1, TL + P), 1)
    h1 = jnp.where(jnp.logical_or(ti > 0, col >= P), h1, 0.0)
    # TODO(synk): nn.Dropout(0.2) is identity in eval mode; training-mode RNG mask not implemented.

    # ---- conv2 ----------------------------------------------------------------------
    h1b = h1.astype(xcur.dtype)                                         # bf16 for the MXU
    w2 = w2_ref[...]
    if fuse_c2:
        h2s = jnp.concatenate([h1b[:, k * d: k * d + TL] for k in range(K)], axis=0)
        y2 = jnp.dot(w2, h2s, preferred_element_type=jnp.float32)       # (Cout_p, TL)
    else:
        y2 = jnp.dot(w2[:, :Cout_p], h1b[:, :TL],
                     preferred_element_type=jnp.float32)
        for k in range(1, K):
            y2 = y2 + jnp.dot(w2[:, k * Cout_p:(k + 1) * Cout_p],
                              h1b[:, k * d: k * d + TL],
                              preferred_element_type=jnp.float32)
    h2 = jnp.maximum(y2 + b2_ref[...], 0.0)

    # ---- residual -------------------------------------------------------------------
    if has_downsample:
        res = y1[Cout_p:, P:] + bd_ref[...]                             # fused 1x1 conv rows
    else:
        res = xcur.astype(jnp.float32)

    out_ref[...] = jnp.maximum(h2 + res, 0.0).astype(out_ref.dtype)


def temporal_block_pallas(x_ncl, w1, b1, w2, b2, wd, bd, *,
                          kernel_size, dilation, padding,
                          tile_l=None, out_dtype=None):
    """x_ncl: (N, Cin, L); w1: (Cout, Cin, K); w2: (Cout, Cout, K); wd: (Cout, Cin, 1)."""
    N, Cin, L = x_ncl.shape
    Cout = w1.shape[0]
    K, d, P = kernel_size, dilation, padding
    assert P == d * (K - 1), "TCN residual add requires padding == dilation*(kernel_size-1)"
    assert P >= 1, "kernel_size must be >= 2 (Chomp1d with chomp_size=0 is ill-defined)"
    has_downsample = (Cin != Cout)
    if out_dtype is None:
        out_dtype = x_ncl.dtype
    out_itemsize = jnp.dtype(out_dtype).itemsize

    # Channel padding to the f32 sublane tile (8): full-sublane vregs, unmasked stores.
    Cin_p, Cout_p = _round_up(Cin, 8), _round_up(Cout, 8)
    # Halo block: smallest lane-aligned window covering the 2P-column history.
    HW = 128 * pl.cdiv(2 * P, 128)
    # Contraction <= 128 -> single fused im2col matmul; else per-tap accumulation.
    fuse_c1 = (K * Cin_p) <= 128
    fuse_c2 = (K * Cout_p) <= 128
    Wm = 2 * Cout_p if has_downsample else Cout_p

    def vmem_est(tl):
        bf, f32 = 2, 4
        ins = 2 * (Cin_p * HW + Cin_p * tl) * bf                 # double-buffered inputs
        wts = 2 * (Wm * K * Cin_p + Cout_p * K * Cout_p) * bf + 6 * Cout_p * f32
        outs = 2 * Cout_p * tl * out_itemsize
        tmp = (Cin_p * (tl + 2 * P) * bf                                     # xh
               + (K * Cin_p * (tl + P) * bf if fuse_c1 else 0)               # x1
               + Wm * (tl + P) * f32                                         # y1
               + Cout_p * (tl + P) * (f32 + bf)                              # h1 + h1b
               + (K * Cout_p * tl * bf if fuse_c2 else 0)                    # h2s
               + 3 * Cout_p * tl * f32)                                      # y2/h2/res
        return ins + wts + outs + tmp

    VMEM_BUDGET = 40 * 1024 * 1024          # headroom under v7x's 64 MiB physical VMEM
    if tile_l is None:
        pref = 128 * min(16, max(1, pl.cdiv(L, 128)))            # cap at 2048 columns
        TL = max(HW, HW * (pref // HW))
        while TL > HW and vmem_est(TL) > VMEM_BUDGET:
            TL -= HW
    else:
        TL = int(tile_l)
        assert TL % HW == 0 and TL % 128 == 0, (TL, HW)

    T = pl.cdiv(L, TL)
    Lr = T * TL
    ratio = TL // HW

    # bf16 activations/weights for the MXU; biases & accumulation stay f32.
    x = x_ncl.astype(jnp.bfloat16)
    x = jnp.pad(x, ((0, 0), (0, Cin_p - Cin), (0, Lr - L)))      # right/channel pad only

    def prep_w(w, ci, cip):
        wp = jnp.pad(w, ((0, Cout_p - w.shape[0]), (0, cip - ci), (0, 0)))
        return jnp.transpose(wp, (0, 2, 1)).reshape(Cout_p, w.shape[2] * cip)

    w1m = prep_w(w1, Cin, Cin_p).astype(jnp.bfloat16)            # (Cout_p, K*Cin_p)
    w2m = prep_w(w2, Cout, Cout_p).astype(jnp.bfloat16)          # (Cout_p, K*Cout_p)
    b1r = jnp.pad(b1, (0, Cout_p - Cout)).reshape(Cout_p, 1).astype(jnp.float32)
    b2r = jnp.pad(b2, (0, Cout_p - Cout)).reshape(Cout_p, 1).astype(jnp.float32)

    halo_spec = pl.BlockSpec((None, Cin_p, HW),
                             lambda n, t: (n, 0, jnp.maximum(t * ratio - 1, 0)))
    cur_spec = pl.BlockSpec((None, Cin_p, TL), lambda n, t: (n, 0, t))
    const = lambda shape: pl.BlockSpec(shape, lambda n, t: (0, 0))

    if has_downsample:
        # Fold the 1x1 downsample into conv1's matmul: extra rows, last-tap block only.
        wdp = jnp.pad(wd[:, :, 0], ((0, Cout_p - Cout), (0, Cin_p - Cin)))
        wd_blk = jnp.zeros((Cout_p, K * Cin_p), jnp.float32).at[:, (K - 1) * Cin_p:].set(wdp)
        w1s = jnp.concatenate([w1m, wd_blk.astype(jnp.bfloat16)], axis=0)   # (2Cout_p, K*Cin_p)
        bdr = jnp.pad(bd, (0, Cout_p - Cout)).reshape(Cout_p, 1).astype(jnp.float32)
        args = (x, x, w1s, b1r, bdr, w2m, b2r)
        in_specs = [halo_spec, cur_spec, const((Wm, K * Cin_p)), const((Cout_p, 1)),
                    const((Cout_p, 1)), const((Cout_p, K * Cout_p)), const((Cout_p, 1))]
    else:
        args = (x, x, w1m, b1r, w2m, b2r)
        in_specs = [halo_spec, cur_spec, const((Wm, K * Cin_p)), const((Cout_p, 1)),
                    const((Cout_p, K * Cout_p)), const((Cout_p, 1))]

    kernel = functools.partial(_temporal_block_kernel, K=K, d=d, P=P, Cout_p=Cout_p,
                               has_downsample=has_downsample,
                               fuse_c1=fuse_c1, fuse_c2=fuse_c2)

    flops = 2 * N * Lr * (Wm * K * Cin_p + Cout_p * K * Cout_p)
    bytes_accessed = (N * Cin_p * Lr * 2 + N * T * Cin_p * HW * 2
                      + (Wm * K * Cin_p + Cout_p * K * Cout_p) * 2
                      + N * Cout_p * Lr * out_itemsize)

    out = pl.pallas_call(
        kernel,
        out_shape=jax.ShapeDtypeStruct((N, Cout_p, Lr), out_dtype),
        grid=(N, T),
        in_specs=in_specs,
        out_specs=pl.BlockSpec((None, Cout_p, TL), lambda n, t: (n, 0, t)),
        compiler_params=pltpu.CompilerParams(
            dimension_semantics=("parallel", "parallel"),
            vmem_limit_bytes=int(min(64 << 20, max(32 << 20, 2 * vmem_est(TL))))),
        cost_estimate=pl.CostEstimate(flops=int(flops), transcendentals=0,
                                      bytes_accessed=int(bytes_accessed)),
    )(*args)

    return out[:, :Cout, :L]


# ---------------- pure-JAX reference (mirrors the PyTorch forward) ----------------
def _conv1d_ref(x, w, b, stride, padding, dilation):
    out = lax.conv_general_dilated(
        x, w, window_strides=(stride,), padding=[(padding, padding)],
        rhs_dilation=(dilation,), dimension_numbers=('NCH', 'OIH', 'NCH'))
    return out + b[None, :, None]


def temporal_block_ref(x, w1, b1, w2, b2, wd, bd, *, kernel_size, dilation, padding):
    o = _conv1d_ref(x, w1, b1, 1, padding, dilation)
    o = o[:, :, :-padding]                      # Chomp1d
    o = jnp.maximum(o, 0.0)                     # ReLU (dropout = identity in eval)
    o = _conv1d_ref(o, w2, b2, 1, padding, dilation)
    o = o[:, :, :-padding]
    o = jnp.maximum(o, 0.0)
    if x.shape[1] != w1.shape[0]:
        res = _conv1d_ref(x, wd, bd, 1, 0, 1)   # 1x1 downsample
    else:
        res = x
    return jnp.maximum(o + res, 0.0)


def _weight_norm(v, g):
    # PyTorch weight_norm, dim=0: w = g * v / ||v|| with norm over all dims but 0
    norm = jnp.sqrt(jnp.sum(v * v, axis=(1, 2), keepdims=True))
    return g.reshape(-1, 1, 1) * v / norm


if __name__ == "__main__":
    def run_case(key, *, N, Cin, Cout, L, K, dilation, tile_l=None, out_dtype=None):
        padding = (K - 1) * dilation
        ks = jax.random.split(key, 9)
        v1 = 0.01 * jax.random.normal(ks[0], (Cout, Cin, K), jnp.float32)
        g1 = 0.5 + jax.random.uniform(ks[1], (Cout,), jnp.float32)
        b1 = 0.1 * jax.random.normal(ks[2], (Cout,), jnp.float32)
        v2 = 0.01 * jax.random.normal(ks[3], (Cout, Cout, K), jnp.float32)
        g2 = 0.5 + jax.random.uniform(ks[4], (Cout,), jnp.float32)
        b2 = 0.1 * jax.random.normal(ks[5], (Cout,), jnp.float32)
        wd = 0.01 * jax.random.normal(ks[6], (Cout, Cin, 1), jnp.float32)
        bd = 0.1 * jax.random.normal(ks[7], (Cout,), jnp.float32)
        w1 = _weight_norm(v1, g1)   # effective conv1 weight
        w2 = _weight_norm(v2, g2)   # effective conv2 weight
        x = jax.random.normal(ks[8], (N, Cin, L), jnp.float32)

        out = temporal_block_pallas(x, w1, b1, w2, b2, wd, bd,
                                    kernel_size=K, dilation=dilation, padding=padding,
                                    tile_l=tile_l, out_dtype=out_dtype)
        out = jax.block_until_ready(out)
        ref = temporal_block_ref(x, w1, b1, w2, b2, wd, bd,
                                 kernel_size=K, dilation=dilation, padding=padding)
        assert out.shape == (N, Cout, L), out.shape
        # bf16 matmul inputs (f32 accumulation) vs. a pure-f32 reference
        ok = jnp.allclose(out.astype(jnp.float32), ref, rtol=5e-2, atol=5e-2)
        assert ok, f"max abs err {jnp.max(jnp.abs(out.astype(jnp.float32) - ref))}"

    key = jax.random.PRNGKey(0)
    k1, k2, k3 = jax.random.split(key, 3)
    # small shapes implied by the module (downsampled residual, fused im2col path)
    run_case(k1, N=2, Cin=4, Cout=8, L=16, K=3, dilation=2)
    # multi-tile (3 time tiles): halo fetch across grid steps, identity residual
    run_case(k2, N=2, Cin=8, Cout=8, L=320, K=3, dilation=2, tile_l=128)
    # wide channels: per-tap accumulating matmuls, fused downsample, halo, bf16 output
    run_case(k3, N=2, Cin=48, Cout=64, L=512, K=3, dilation=4, tile_l=256,
             out_dtype=jnp.bfloat16)
    print("KERNEL_OK")
</pallas_src>

<mosaic_0001>
module attributes {stable_mosaic.version = 11 : i64} {
  func.func @_temporal_block_kernel(%arg0: i32, %arg1: i32, %arg2: memref<1x8x128xbf16, #tpu.memory_space<vmem>>, %arg3: memref<1x8x128xbf16, #tpu.memory_space<vmem>>, %arg4: memref<16x24xbf16, #tpu.memory_space<vmem>>, %arg5: memref<8x1xf32, #tpu.memory_space<vmem>>, %arg6: memref<8x1xf32, #tpu.memory_space<vmem>>, %arg7: memref<8x24xbf16, #tpu.memory_space<vmem>>, %arg8: memref<8x1xf32, #tpu.memory_space<vmem>>, %arg9: memref<1x8x128xf32, #tpu.memory_space<vmem>>) attributes {dimension_semantics = [#tpu.dimension_semantics<parallel>, #tpu.dimension_semantics<parallel>], iteration_bounds = array<i64: 2, 1>, scalar_prefetch = 0 : i64, scratch_operands = 0 : i64, tpu.core_type = #tpu.core_type<tc>, window_params = [{transform_indices = @transform_0, window_bounds = array<i64: 1, 8, 128>}, {transform_indices = @transform_1, window_bounds = array<i64: 1, 8, 128>}, {pipeline_mode = #tpu.pipeline_mode<synchronous>, transform_indices = @transform_2, window_bounds = array<i64: 16, 24>}, {pipeline_mode = #tpu.pipeline_mode<synchronous>, transform_indices = @transform_3, window_bounds = array<i64: 8, 1>}, {pipeline_mode = #tpu.pipeline_mode<synchronous>, transform_indices = @transform_4, window_bounds = array<i64: 8, 1>}, {pipeline_mode = #tpu.pipeline_mode<synchronous>, transform_indices = @transform_5, window_bounds = array<i64: 8, 24>}, {pipeline_mode = #tpu.pipeline_mode<synchronous>, transform_indices = @transform_6, window_bounds = array<i64: 8, 1>}, {transform_indices = @transform_7, window_bounds = array<i64: 1, 8, 128>}]} {
    %c0 = arith.constant 0 : index
    %c0_0 = arith.constant 0 : index
    %c120 = arith.constant 120 : index
    %0 = vector.load %arg2[%c0, %c0_0, %c120] : memref<1x8x128xbf16, #tpu.memory_space<vmem>>, vector<1x8x8xbf16>
    %1 = vector.shape_cast %0 : vector<1x8x8xbf16> to vector<8x8xbf16>
    %c0_i32 = arith.constant 0 : i32
    %2 = arith.cmpi sgt, %arg1, %c0_i32 : i32
    %cst = arith.constant 0.000000e+00 : bf16
    %3 = vector.broadcast %cst : bf16 to vector<8x8xbf16>
    %4 = arith.select %2, %1, %3 : vector<8x8xbf16>
    %c0_1 = arith.constant 0 : index
    %c0_2 = arith.constant 0 : index
    %c0_3 = arith.constant 0 : index
    %5 = vector.load %arg3[%c0_1, %c0_2, %c0_3] : memref<1x8x128xbf16, #tpu.memory_space<vmem>>, vector<1x8x128xbf16>
    %6 = vector.shape_cast %5 : vector<1x8x128xbf16> to vector<8x128xbf16>
    %7 = tpu.concatenate %4, %6 in 1 : vector<8x8xbf16>, vector<8x128xbf16> -> vector<8x136xbf16>
    %c0_4 = arith.constant 0 : index
    %c0_5 = arith.constant 0 : index
    %8 = vector.load %arg4[%c0_4, %c0_5] : memref<16x24xbf16, #tpu.memory_space<vmem>>, vector<16x24xbf16>
    %9 = vector.extract_strided_slice %7 {offsets = [0, 0], sizes = [8, 132], strides = [1, 1]} : vector<8x136xbf16> to vector<8x132xbf16>
    %10 = vector.extract_strided_slice %7 {offsets = [0, 2], sizes = [8, 132], strides = [1, 1]} : vector<8x136xbf16> to vector<8x132xbf16>
    %11 = vector.extract_strided_slice %7 {offsets = [0, 4], sizes = [8, 132], strides = [1, 1]} : vector<8x136xbf16> to vector<8x132xbf16>
    %12 = tpu.concatenate %9, %10, %11 in 0 : vector<8x132xbf16>, vector<8x132xbf16>, vector<8x132xbf16> -> vector<24x132xbf16>
    %cst_6 = arith.constant dense<0.000000e+00> : vector<16x132xf32>
    %13 = tpu.matmul %8, %12, %cst_6 {dimension_numbers = #tpu.dot_dimension_numbers<[1], [0], [0], [1], [0, 0, 1, 1], [], []>} : vector<16x24xbf16>, vector<24x132xbf16>, vector<16x132xf32> -> vector<16x132xf32>
    %14 = vector.extract_strided_slice %13 {offsets = [0, 0], sizes = [8, 132], strides = [1, 1]} : vector<16x132xf32> to vector<8x132xf32>
    %c0_7 = arith.constant 0 : index
    %c0_8 = arith.constant 0 : index
    %15 = vector.load %arg5[%c0_7, %c0_8] : memref<8x1xf32, #tpu.memory_space<vmem>>, vector<8x1xf32>
    %16 = vector.broadcast %15 : vector<8x1xf32> to vector<8x132xf32>
    %17 = arith.addf %14, %16 : vector<8x132xf32>
    %cst_9 = arith.constant 0.000000e+00 : f32
    %18 = vector.broadcast %cst_9 : f32 to vector<8x132xf32>
    %19 = arith.maximumf %17, %18 : vector<8x132xf32>
    %20 = tpu.iota {dimensions = array<i32: 1>} : vector<1x132xi32>
    %c0_i32_10 = arith.constant 0 : i32
    %21 = arith.cmpi sgt, %arg1, %c0_i32_10 : i32
    %c4_i32 = arith.constant 4 : i32
    %22 = vector.broadcast %c4_i32 : i32 to vector<1x132xi32>
    %23 = arith.cmpi sge, %20, %22 : vector<1x132xi32>
    %24 = vector.broadcast %21 : i1 to vector<1x132xi1>
    %25 = arith.ori %24, %23 : vector<1x132xi1>
    %cst_11 = arith.constant 0.000000e+00 : f32
    %26 = vector.shape_cast %25 : vector<1x132xi1> to vector<1x132xi1>
    %27 = vector.broadcast %26 : vector<1x132xi1> to vector<8x132xi1>
    %28 = vector.broadcast %cst_11 : f32 to vector<8x132xf32>
    %29 = arith.select %27, %19, %28 : vector<8x132xi1>, vector<8x132xf32>
    %30 = arith.truncf %29 : vector<8x132xf32> to vector<8x132xbf16>
    %c0_12 = arith.constant 0 : index
    %c0_13 = arith.constant 0 : index
    %31 = vector.load %arg7[%c0_12, %c0_13] : memref<8x24xbf16, #tpu.memory_space<vmem>>, vector<8x24xbf16>
    %32 = vector.extract_strided_slice %30 {offsets = [0, 0], sizes = [8, 128], strides = [1, 1]} : vector<8x132xbf16> to vector<8x128xbf16>
    %33 = vector.extract_strided_slice %30 {offsets = [0, 2], sizes = [8, 128], strides = [1, 1]} : vector<8x132xbf16> to vector<8x128xbf16>
    %34 = vector.extract_strided_slice %30 {offsets = [0, 4], sizes = [8, 128], strides = [1, 1]} : vector<8x132xbf16> to vector<8x128xbf16>
    %35 = tpu.concatenate %32, %33, %34 in 0 : vector<8x128xbf16>, vector<8x128xbf16>, vector<8x128xbf16> -> vector<24x128xbf16>
    %cst_14 = arith.constant dense<0.000000e+00> : vector<8x128xf32>
    %36 = tpu.matmul %31, %35, %cst_14 {dimension_numbers = #tpu.dot_dimension_numbers<[1], [0], [0], [1], [0, 0, 1, 1], [], []>} : vector<8x24xbf16>, vector<24x128xbf16>, vector<8x128xf32> -> vector<8x128xf32>
    %c0_15 = arith.constant 0 : index
    %c0_16 = arith.constant 0 : index
    %37 = vector.load %arg8[%c0_15, %c0_16] : memref<8x1xf32, #tpu.memory_space<vmem>>, vector<8x1xf32>
    %38 = vector.broadcast %37 : vector<8x1xf32> to vector<8x128xf32>
    %39 = arith.addf %36, %38 : vector<8x128xf32>
    %cst_17 = arith.constant 0.000000e+00 : f32
    %40 = vector.broadcast %cst_17 : f32 to vector<8x128xf32>
    %41 = arith.maximumf %39, %40 : vector<8x128xf32>
    %42 = vector.extract_strided_slice %13 {offsets = [8, 4], sizes = [8, 128], strides = [1, 1]} : vector<16x132xf32> to vector<8x128xf32>
    %c0_18 = arith.constant 0 : index
    %c0_19 = arith.constant 0 : index
    %43 = vector.load %arg6[%c0_18, %c0_19] : memref<8x1xf32, #tpu.memory_space<vmem>>, vector<8x1xf32>
    %44 = vector.broadcast %43 : vector<8x1xf32> to vector<8x128xf32>
    %45 = arith.addf %42, %44 : vector<8x128xf32>
    %46 = arith.addf %41, %45 : vector<8x128xf32>
    %cst_20 = arith.constant 0.000000e+00 : f32
    %47 = vector.broadcast %cst_20 : f32 to vector<8x128xf32>
    %48 = arith.maximumf %46, %47 : vector<8x128xf32>
    %c0_21 = arith.constant 0 : index
    %c0_22 = arith.constant 0 : index
    %c0_23 = arith.constant 0 : index
    %49 = vector.load %arg9[%c0_21, %c0_22, %c0_23] : memref<1x8x128xf32, #tpu.memory_space<vmem>>, vector<1x8x128xf32>
    %50 = vector.shape_cast %49 : vector<1x8x128xf32> to vector<8x128xf32>
    %51 = vector.shape_cast %48 : vector<8x128xf32> to vector<1x8x128xf32>
    tpu.vector_store %arg9[%c0_21, %c0_22, %c0_23], %51 {strides = array<i32>} : memref<1x8x128xf32, #tpu.memory_space<vmem>>, vector<1x8x128xf32>,
    return
  }
  func.func @transform_0(%arg0: i32, %arg1: i32) -> (i32, i32, i32) {
    %c1_i32 = arith.constant 1 : i32
    %0 = arith.muli %arg1, %c1_i32 : i32
    %c1_i32_0 = arith.constant 1 : i32
    %1 = arith.subi %0, %c1_i32_0 : i32
    %c0_i32 = arith.constant 0 : i32
    %2 = arith.maxsi %1, %c0_i32 : i32
    %c0_i32_1 = arith.constant 0 : i32
    %c0_i32_2 = arith.constant 0 : i32
    return %arg0, %c0_i32_1, %2 : i32, i32, i32
  }
  func.func @transform_1(%arg0: i32, %arg1: i32) -> (i32, i32, i32) {
    %c0_i32 = arith.constant 0 : i32
    %c0_i32_0 = arith.constant 0 : i32
    return %arg0, %c0_i32, %arg1 : i32, i32, i32
  }
  func.func @transform_2(%arg0: i32, %arg1: i32) -> (i32, i32) {
    %c0_i32 = arith.constant 0 : i32
    %c0_i32_0 = arith.constant 0 : i32
    %c0_i32_1 = arith.constant 0 : i32
    return %c0_i32, %c0_i32_0 : i32, i32
  }
  func.func @transform_3(%arg0: i32, %arg1: i32) -> (i32, i32) {
    %c0_i32 = arith.constant 0 : i32
    %c0_i32_0 = arith.constant 0 : i32
    %c0_i32_1 = arith.constant 0 : i32
    return %c0_i32, %c0_i32_0 : i32, i32
  }
  func.func @transform_4(%arg0: i32, %arg1: i32) -> (i32, i32) {
    %c0_i32 = arith.constant 0 : i32
    %c0_i32_0 = arith.constant 0 : i32
    %c0_i32_1 = arith.constant 0 : i32
    return %c0_i32, %c0_i32_0 : i32, i32
  }
  func.func @transform_5(%arg0: i32, %arg1: i32) -> (i32, i32) {
    %c0_i32 = arith.constant 0 : i32
    %c0_i32_0 = arith.constant 0 : i32
    %c0_i32_1 = arith.constant 0 : i32
    return %c0_i32, %c0_i32_0 : i32, i32
  }
  func.func @transform_6(%arg0: i32, %arg1: i32) -> (i32, i32) {
    %c0_i32 = arith.constant 0 : i32
    %c0_i32_0 = arith.constant 0 : i32
    %c0_i32_1 = arith.constant 0 : i32
    return %c0_i32, %c0_i32_0 : i32, i32
  }
  func.func @transform_7(%arg0: i32, %arg1: i32) -> (i32, i32, i32) {
    %c0_i32 = arith.constant 0 : i32
    %c0_i32_0 = arith.constant 0 : i32
    return %arg0, %c0_i32, %arg1 : i32, i32, i32
  }
}

</mosaic_0001>

<bundles_post_ra>
// kernel: tpu_custom_call.1
= control target key start
LH: loop header
LB: loop body
LE: loop exit
PB: predicated region body
PF: predicated region fallthrough
CT: control target
= control target key end

     0   :  { %12 = vsyncpa [#allocation3], 0  ;;  %s1041_s0 = inlined_call_operand.vmem [shape: bf16[2,8,128], index: 0, kind: input, shape index: {}]   ;;  %s1042_s1 = inlined_call_operand.vmem [shape: bf16[2,8,128], index: 1, kind: input, shape index: {}]   ;;  %s1043_s2 = inlined_call_operand.vmem [shape: bf16[16,24], index: 2, kind: input, shape index: {}]   ;;  %s1044_s3 = inlined_call_operand.vmem [shape: f32[8,1], index: 3, kind: input, shape index: {}]   ;;  %s1045_s4 = inlined_call_operand.vmem [shape: f32[8,1], index: 4, kind: input, shape index: {}]   ;;  %s1046_s5 = inlined_call_operand.vmem [shape: bf16[8,24], index: 5, kind: input, shape index: {}]   ;;  %s1047_s6 = inlined_call_operand.vmem [shape: f32[8,1], index: 6, kind: input, shape index: {}]   ;;  %s1048_s7 = inlined_call_operand.hbm [shape: f32[2,8,128], index: 7, kind: output, shape index: {}]  }
   0x1   :  { %14 = vsyncpa [#allocation3 + $0x1], 0  ;;  %s891_s23 = smov 0   ;;  %s893_s24 = smov 0  }
   0x2   :  { %s895_s25 = smov 0   ;;  %s897_s26 = smov 0  }
   0x3   :  { %s899_s27 = smov 0   ;;  %s901_s28 = smov 0  }
   0x4 LB: > { %s670_s29 = sadd.s32 4294967295, %s842_s28   ;;  %s671_s30 = sadd.s32 4294967294, %s842_s28   ;;  %s842_s28 = sphi %s901_s28, %s20_s28   ;;  %s838_s27 = sphi %s899_s27, %s1055_s27   ;;  %s834_s26 = sphi %s897_s26, %s1054_s26   ;;  %s830_s25 = sphi %s895_s25, %s1053_s25   ;;  %s826_s24 = sphi %s893_s24, %s1052_s24   ;;  %s822_s23 = sphi %s891_s23, %s1051_s23  }
   0x5   : > { %s32_s8 = sadd.s32 1, %s838_s27  ;;  %s208_s9 = sadd.s32 1, %s830_s25 }
   0x6   : > { %p34_p0 = scmp.ge.s32.totalorder %s32_s8, 2  ;;  %p218_p1 = scmp.ne.s32.totalorder %s830_s25, %s826_s24 }
   0x7   : > { %p219_p2 = scmp.eq.s32.totalorder %s670_s29, 1  ;;  %p224_p3 = scmp.ne.s32.totalorder %s826_s24, %s822_s23 }
   0x8   : > { %s1057_s8 = smov (%p34_p0, %s32_s8), 0  ;;  %p225_p5 = scmp.eq.s32.totalorder %s671_s30, 1 }
   0x9   : > { %p931_p4 = por %p219_p2, %p218_p1  ;;  %s203_s11 = ssub.s32 %s838_s27, %s1057_s8 }
   0xa   : > { %p674_p6 = scmp.ge.s32.totalorder %s842_s28, 1  ;;  %p206_p7 = scmp.eq.s32.totalorder %s203_s11, 0 }
   0xb   : > { %p938_p8 = por %p225_p5, %p224_p3  ;;  %p284_p9 = scmp.lt.s32.totalorder %s842_s28, 3 }
   0xc   : > { %s944_s13 = scalar_select %p206_p7, %s830_s25, %s208_s9  }
   0xd   : > { %p285_p10 = pnand %p674_p6, %p284_p9 }
   0xe   : > { %p341_p11 = scmp.lt.s32.totalorder (!%p285_p10), %s834_s26, 1  ;;  %v844_v0 = vmov (!%p285_p10), 0   ;;  %s845_s15 = smov (!%p285_p10), 8   ;;  %vm366_vm0 = vcmask (!%p285_p10), 64512   ;;  %v452_v7 = vld [vmem:[%s1044_s3] sm:$0xff] (!%p285_p10)  ;;  %vm387_vm1 = vcmask (!%p285_p10), 1043456   ;;  %v462_v19 = vlaneseq (!%p285_p10) }
   0xf   : > { %288 = sbr.rel (%p285_p10) target bundleno = 855 (0x357), region = 48  ;;  %v678_v1 = vcombine.low (!%p285_p10), %v844_v0, %v844_v0  ;;  %441 = vmatprep.mubr.bf16.mxu0 (!%p285_p10), %v844_v0  ;;  %760 = vset.pattern.permute.xlu0 (!%p285_p10), %v844_v0  ;;  %s846_s20 = smov (!%p285_p10), 124   ;;  %vm379_vm2 = vcmask (!%p285_p10), 1031168   ;;  %vm385_vm3 = vcmask (!%p285_p10), 1014784   ;;  %v763_v18 = vld [vmem:[%s1043_s2] sm:$0xff] (!%p285_p10)   ;;  %vm399_vm4 = vcmask (!%p285_p10), 195584  }
  0x10   : > { %761 = vset.pattern.permute.xlu1 (!%p285_p10), %v844_v0  ;;  %s847_s21 = smov (!%p285_p10), 126   ;;  %v463_v21 = vand.u32 (!%p285_p10), 127, %v462_v19  ;;  %v848_v27 = vmov (!%p285_p10), 0.0   ;;  %vm849_vm6 = vmmov (!%p285_p10), 0   ;;  %v549_v35 = vld [vmem:[%s1045_s4] sm:$0xff] (!%p285_p10)  ;;  %s325_s18 = sand.u32 (!%p285_p10), 1, %s826_s24  }
  0x11   : > { %359 = vrot.lane.b32.xlu0 (!%p285_p10), %v678_v1, %s845_s15  ;;  %691 = vmatprep.subr.bf16.mxu1 (!%p285_p10), %v848_v27  ;;  %v496_v37 = vld [vmem:[%s1047_s6] sm:$0xff] (!%p285_p10)  ;;  %s570_s9 = scalar_lea.sflag (!%p285_p10), [#allocation3], %s325_s18 }
  0x12   : > { %vm465_vm5 = vcmp.ge.s32.totalorder (!%p285_p10), %v463_v21, 4  ;;  %695 = vmatprep.mubr.msk.bf16.mxu1 (!%p285_p10), %vm849_vm6, %v848_v27  ;;  %v477_v46 = vld [vmem:[%s1046_s5] sm:$0xf] (!%p285_p10) }
  0x16   : > { %s342_s14 = scalar_select %p341_p11, %s834_s26, 1 }
  0x18   : > { %s677_s16 = sshll.u32 %s342_s14, 2 }
  0x19   : > { %s347_s19 = scalar_lea.vmem %s1042_s1, %s677_s16 }
  0x1a   : > { %v762_v2 = vld [vmem:[%s347_s19] ss:$0 sps:$4 sm:$0xff]   ;;  %s675_s19 = sshll.u32 %s325_s18, 3 }
  0x1b   : > { %364 = vrot.lane.b32.xlu0 %v762_v2, %s845_s15  ;;  %s327_s22 = scalar_lea.vmem [#allocation2], %s675_s19 }
  0x1c   : > { %s584_s0 = sshll.u32 %s327_s22, 4  ;;  %s996_s0 = int_to_ptr.vmem [resolvable:$true] %s584_s0 }
  0x1d   : > { %s764_s11 = scalar_lea.vmem %s996_s0, 128 }
  0x1e   : > { %p765_p12 = scmp.ne.s32.totalorder %s996_s0, %s764_s11 }
  0x20   : > { %p766_p13 = pnand %p765_p12, %p931_p4 }
  0x22   : > { %p767_p0 = pneg %p766_p13 }
  0x83   : > { %v360_v3 = vpop.permute.xlu0 %359 }
  0x8d   : > { %v365_v4 = vpop.permute.xlu0 %364 }
  0x8e   : > { %v369_v5 = vsel %vm366_vm0, %v360_v3, %v365_v4  ;;  %v374_v6 = vrot.slane %v365_v4, 4 }
  0x8f   : > { %381 = vrot.lane.b32.xlu0 %v369_v5, %s846_s20  ;;  %v373_v8 = vrot.slane %v369_v5, 4 }
  0x90   : > { %377 = vrot.lane.b32.xlu1 %v374_v6, %s847_s21 }
  0x93   : > { %455 = vperm.xlu0 %760, %v452_v7  }
  0x94   : > { %375 = vrot.lane.b32.xlu1 %v373_v8, %s847_s21 }
  0x98   : > { %383 = vrot.lane.b32.xlu1 %v365_v4, %s846_s20 }
 0x101   : > { %v382_v14 = vpop.permute.xlu0 %381 }
 0x102   : > { %v378_v9 = vpop.permute.xlu1 %377 }
 0x103   : > { %v392_v10 = vsel %vm387_vm1, %v365_v4, %v378_v9 }
 0x104   : > { %409 = vmatprep.subr.bf16.mxu0 %v392_v10 }
 0x106   : > { %v376_v11 = vpop.permute.xlu1 %375 }
 0x107   : > { %v380_v12 = vsel %vm379_vm2, %v376_v11, %v378_v9 }
 0x108   : > { %v389_v13 = vsel %vm387_vm1, %v369_v5, %v380_v12 }
 0x109   : > { %410 = vmatpush1.bf16.msra.mxu0 %v389_v13 }
 0x10a   : > { %v384_v15 = vpop.permute.xlu1 %383 }
 0x10b   : > { %v386_v16 = vsel %vm385_vm3, %v382_v14, %v384_v15  ;;  %681 = vmatprep.subr.msk.bf16.mxu0 %vm387_vm1, %v384_v15 }
 0x10c   : > { %v404_v17 = vsel %vm387_vm1, %v386_v16, 0 }
 0x10d   : > { %412 = vmatpush1.bf16.msra.mxu0 %v404_v17 }
 0x110   : > { %682 = vmatmul.mubr.msk.bf16.vlgmr.msra.gmra.mrb[0].mxu0 %vm399_vm4, %v763_v18 }
 0x112   : > { %v456_v20 = vpop.permute.xlu0 %455 }
 0x1e3   : > { %v443_v22 = vpop.f32.mrb[0].mxu0 }
 0x1e4   : > { %v458_v23 = vadd.f32 %v456_v20, %v443_v22  ;;  %v445_v24 = vpop.f32.mrb[1].mxu0 }
 0x1e5   : > { %v459_v25 = vadd.f32 %v456_v20, %v445_v24  ;;  %v447_v26 = vpop.f32.mrb[2].mxu0 }
 0x1e6   : > { %v460_v28 = vmax.f32 %v458_v23, 0.0  ;;  %v449_v29 = vpop.f32.mrb[3].mxu0 }
 0x1e7   : > { %v461_v30 = vmax.f32 %v459_v25, 0.0 }
 0x1e8   : > { %v473_v31 = vsel %vm465_vm5, %v460_v28, 0.0 }
 0x1e9   : > { %v475_v32 = vpack.c.bf16 %v473_v31, %v473_v31  ;;  %v476_v33 = vpack.c.bf16 %v461_v30, %v461_v30 }
 0x1eb   : > { %487 = vrot.lane.b32.xlu0 %v475_v32, %s846_s20  ;;  %v480_v34 = vrot.slane %v475_v32, 4  ;;  %v481_v36 = vrot.slane %v476_v33, 4 }
 0x1ed   : > { %482 = vrot.lane.b32.xlu1 %v480_v34, %s847_s21 }
 0x1ef   : > { %552 = vperm.xlu0 %760, %v549_v35  }
 0x1f1   : > { %484 = vrot.lane.b32.xlu1 %v481_v36, %s847_s21  ;;  %s685_s21 = sshll.u32 %s834_s26, 7  ;;  %s850_s26 = smov [#allocation2]  }
 0x1f2   : > { %s994_s30 = scalar_lea.hbm %s1048_s7, %s685_s21  ;;  %s768_s14 = sshll.u32 %s850_s26, 4  ;;  %s769_s14 = int_to_ptr.vmem [resolvable:$false] %s768_s14 }
 0x1f3   : > { %s770_s15 = scalar_lea.vmem %s769_s14, 256  ;;  %p771_p1 = scmp.lt.s32.totalorder %s996_s0, %s769_s14 }
 0x1f4   : > { %p772_p2 = scmp.lt.s32.totalorder %s770_s15, %s764_s11 }
 0x1f5   : > { %489 = vrot.lane.b32.xlu1 %v476_v33, %s846_s20 }
 0x1f6   : > { %p773_p3 = por %p772_p2, %p771_p1 }
 0x1f8   : > { %p774_p5 = pnand %p773_p3, %p767_p0 }
 0x1f9   : > { %499 = vperm.xlu1 %761, %v496_v37  }
 0x25d   : > { %v488_v42 = vpop.permute.xlu0 %487 }
 0x25f   : > { %v483_v38 = vpop.permute.xlu1 %482 }
 0x263   : > { %v485_v39 = vpop.permute.xlu1 %484 }
 0x264   : > { %v486_v40 = vsel %vm379_vm2, %v483_v38, %v485_v39 }
 0x265   : > { %v494_v41 = vsel %vm387_vm1, %v475_v32, %v486_v40 }
 0x266   : > { %692 = vmatpush3.bf16.msra.mxu1 %v494_v41 }
 0x267   : > { %v490_v43 = vpop.permute.xlu1 %489  ;;  %693 = vmatprep.subr.bf16.mxu1 %v848_v27 }
 0x268   : > { %v491_v44 = vsel %vm385_vm3, %v488_v42, %v490_v43 }
 0x269   : > { %v506_v45 = vsel %vm387_vm1, %v491_v44, 0 }
 0x26a   : > { %694 = vmatpush3.bf16.msra.mxu1 %v506_v45 }
 0x26d   : > { %696 = vmatmul.mubr.msk.bf16.vlgmr.msra.gmra.mrb[0].mxu1 %vm399_vm4, %v477_v46 }
 0x26e   : > { %v553_v47 = vpop.permute.xlu0 %552 }
 0x26f   : > { %v555_v48 = vadd.f32 %v553_v47, %v447_v26  ;;  %v556_v49 = vadd.f32 %v553_v47, %v449_v29 }
 0x271   : > { %559 = vrot.lane.b32.xlu0 %v555_v48, %s846_s20  ;;  %561 = vrot.lane.b32.xlu1 %v556_v49, %s846_s20 }
 0x278   : > { %v500_v50 = vpop.permute.xlu1 %499 }
 0x2e3   : > { %v560_v51 = vpop.permute.xlu0 %559  ;;  %v562_v53 = vpop.permute.xlu1 %561 }
 0x2e4   : > { %v564_v59 = vsel %vm385_vm3, %v560_v51, %v562_v53 }
 0x340   : > { %v542_v52 = vpop.f32.mrb[0].mxu1 }
 0x341   : > { %v543_v54 = vadd.f32 %v542_v52, %v500_v50  ;;  %v697_v55 = vpop.f32.mrb[1].mxu1 }
 0x342   : > { %v545_v56 = vpop.f32.mrb[2].mxu1 }
 0x343   : > { %v548_v57 = vmax.f32 %v543_v54, 0.0  ;;  %v698_v58 = vpop.f32.mrb[3].mxu1 }
 0x345   : > { %v566_v60 = vadd.f32 %v564_v59, %v548_v57 }
 0x347   : > { %v567_v61 = vmax.f32 %v566_v60, 0.0 }
 0x349   : > { %568 = vst [vmem:[%s327_s22] sm:$0xff] %v567_v61 }
 0x34a   : > { %777 = shalt.err (!%p774_p5)
}
 0x34b   : > { %s778_s16 = scalar_lea.hbm %s994_s30, 128  ;;  %s782_s19 = scalar_lea.hbm %s1048_s7, 256 }
 0x34c   : > { %p779_p6 = scmp.ne.s32.totalorder %s994_s30, %s778_s16  ;;  %p783_p10 = scmp.lt.u32.totalorder %s994_s30, %s1048_s7 }
 0x34d   : > { %p784_p11 = scmp.lt.u32.totalorder %s782_s19, %s778_s16  ;;  %p786_p13 = scmp.lt.u32.totalorder %s778_s16, %s994_s30 }
 0x34e   : > { %p780_p7 = pnand %p779_p6, %p931_p4 }
 0x34f   : > { %p785_p12 = por %p784_p11, %p783_p10 }
 0x350   : > { %p781_p9 = pneg %p780_p7 }
 0x351   : > { %p787_p0 = por %p786_p13, %p785_p12 }
 0x353   : > { %p788_p1 = pnand %p787_p0, %p781_p9 }
 0x355   : > { %791 = shalt.err (!%p788_p1)
}
 0x356   : > { %699 = dma.vmem_to_hbm [thread:$0]  (%p931_p4), %s996_s0, 128, %s994_s30, %s570_s9  }
 0x357 PF: > { %p705_p2 = scmp.ge.s32.totalorder %s842_s28, 2  ;;  %s596_s20 = sand.u32 1, %s822_s23  }
 0x358   : > { %s597_s29 = scalar_lea.sflag [#allocation3], %s596_s20 }
 0x359   : > { %p702_p3 = pnand %p705_p2, %p938_p8 }
 0x35b   : > { %817 = dma.done.wait (!%p702_p3), %s597_s29, 128  }
 0x35c   : > { %819 = vsyncadd (!%p702_p3), %s597_s29, 4294967168  ;;  %s20_s28 = sadd.s32 1, %s842_s28   ;;  %s1051_s23 = smov %s826_s24 }
 0x35d   : > { %p17_p5 = scmp.ge.s32.totalorder %s20_s28, 4   ;;  %s1052_s24 = smov %s830_s25 }
 0x35e   : > { %s1053_s25 = smov %s944_s13  ;;  %s1054_s26 = smov %s838_s27 }
 0x35f   : > { %s1055_s27 = smov %s1057_s8  ;;  %19 = sbr.rel (!%p17_p5) target bundleno = 4 (0x4), region = 86 }
 0x366   :  { %602 = vsyncpa [#allocation3], 1 }
 0x367   :  { %604 = vsyncpa [#allocation3 + $0x1], 1 }

</bundles_post_ra>
